<compile_context>
chip_gen: v7x
topology: tpu7x:2x2x1
jax: 0.10.0
libtpu: 0.0.40
codegen_flags: <defaults>
</compile_context>

<pallas_src>
from typing import Optional

import jax
import jax.numpy as jnp
from jax.experimental import pallas as pl
from jax.experimental.pallas import tpu as pltpu


def _round_up(x: int, m: int) -> int:
    return ((x + m - 1) // m) * m


def _cdiv(a: int, b: int) -> int:
    return -(-a // b)


def _vmem_cap_bytes() -> int:
    """Per-core VMEM capacity; conservative (v7x) fallback if unavailable."""
    try:
        cap = int(pltpu.get_tpu_info().vmem_capacity_bytes)
        if cap > 0:
            return cap
    except Exception:
        pass
    return 64 << 20  # v7x per-TC VMEM


def _spec(shape, index_map, buffers: Optional[int] = None) -> pl.BlockSpec:
    """BlockSpec, optionally single/multi-buffered (grid-invariant operands)."""
    if buffers is not None and hasattr(pl, "Buffered"):
        try:
            return pl.BlockSpec(shape, index_map, pipeline_mode=pl.Buffered(buffers))
        except TypeError:
            pass
    return pl.BlockSpec(shape, index_map)


def _pick_batch_tile(b: int, base: int = 1024, max_tile: int = 1024) -> int:
    """Largest tile <= max_tile that minimizes tail padding (per perf review)."""
    n_tiles = max(1, _cdiv(b, base))
    tb = _round_up(_cdiv(b, n_tiles), 8)
    return min(tb, max_tile)


# --------------------------------------------------------------------------- #
# Kernels
# --------------------------------------------------------------------------- #
def _resident_kernel(idx_ref, w_ref, shared_ref, out_ref):
    # idx_ref:    [TB, 1]   int32   batch tile of indices
    # w_ref:      [NEp, D]  table (whole, VMEM-resident, single-buffered)
    # shared_ref: [1,  D]   zero-padded shared row (f32)
    # out_ref:    [TB, D]   f32
    tb = out_ref.shape[0]
    nep = w_ref.shape[0]
    idx = idx_ref[...]                                            # (TB, 1)
    lane = jax.lax.broadcasted_iota(jnp.int32, (tb, nep), 1)
    onehot = (lane == idx).astype(w_ref.dtype)                    # exact 0/1
    emb = jnp.dot(onehot, w_ref[...], preferred_element_type=jnp.float32)
    out_ref[...] = (emb + shared_ref[...]).astype(out_ref.dtype)


def _make_ktiled_kernel(tk: int):
    def kernel(idx_ref, w_ref, shared_ref, out_ref, acc_ref):
        # grid = (batch tiles, vocab tiles); vocab axis is the reduction.
        k = pl.program_id(1)

        @pl.when(k == 0)
        def _init():
            acc_ref[...] = jnp.zeros_like(acc_ref)

        tb = out_ref.shape[0]
        idx = idx_ref[...]                                        # (TB, 1)
        lane = jax.lax.broadcasted_iota(jnp.int32, (tb, tk), 1) + k * tk
        onehot = (lane == idx).astype(w_ref.dtype)
        acc_ref[...] += jnp.dot(onehot, w_ref[...],
                                preferred_element_type=jnp.float32)

        @pl.when(k == pl.num_programs(1) - 1)
        def _finalize():
            out_ref[...] = (acc_ref[...] + shared_ref[...]).astype(out_ref.dtype)

    return kernel


# --------------------------------------------------------------------------- #
# Module
# --------------------------------------------------------------------------- #
class SharedEmbeddingsPallas:
    """JAX/Pallas port of torchkeras SharedEmbeddings (forward pass)."""

    def __init__(self, num_embed: int, embed_dim: int,
                 add_shared_embed: bool = False,
                 frac_shared_embed: float = 0.25,
                 key=None,
                 table_dtype=jnp.float32,
                 vocab_tile: Optional[int] = None):
        assert frac_shared_embed < 1, "'frac_shared_embed' must be less than 1"
        self.num_embed = num_embed
        self.embed_dim = embed_dim
        self.add_shared_embed = add_shared_embed
        self.table_dtype = jnp.dtype(table_dtype)
        self.col_embed_dim = embed_dim if add_shared_embed else int(
            embed_dim * frac_shared_embed)

        if key is None:
            key = jax.random.PRNGKey(0)
        k_w, k_s = jax.random.split(key)

        # nn.Embedding init ~ N(0,1), clamped to [-2,2], padding_idx=0 zeroed.
        w = jax.random.normal(k_w, (num_embed, embed_dim), dtype=jnp.float32)
        w = jnp.clip(w, -2.0, 2.0).at[0].set(0.0)
        self.weight = w
        # shared_embed ~ U(-1, 1), [1, col_embed_dim]
        self.shared_embed = jax.random.uniform(
            k_s, (1, self.col_embed_dim), dtype=jnp.float32,
            minval=-1.0, maxval=1.0)

        # ----- kernel-side layouts ------------------------------------------
        itemsize = self.table_dtype.itemsize
        d_lanes = _round_up(max(embed_dim, 1), 128)      # VMEM lane footprint
        nep0 = _round_up(max(num_embed, 1), 128)         # lane-dense one-hot
        self._vmem_cap = _vmem_cap_bytes()

        if vocab_tile is not None:
            tk = min(_round_up(vocab_tile, 128), nep0)
        else:
            # Keep MXU K-depth <= 1024, and each streamed table buffer small.
            per_buf_budget = min(8 << 20, self._vmem_cap // 8)
            tk_mem = max(128, (per_buf_budget // max(1, d_lanes * itemsize))
                         // 128 * 128)
            tk = int(min(nep0, 1024, tk_mem))
        self._TK = tk
        self._NEp = _round_up(nep0, tk)                  # full K blocks only
        self._num_k = self._NEp // tk
        self._d_lanes = d_lanes

        # Kernel table: zero-padded rows; in replace mode the first
        # col_embed_dim columns are zeroed so `emb + shared` == overwrite.
        w_k = jnp.zeros((self._NEp, embed_dim), self.table_dtype)
        w_k = w_k.at[:num_embed, :].set(self.weight.astype(self.table_dtype))
        if not add_shared_embed:
            w_k = w_k.at[:, : self.col_embed_dim].set(0.0)
        self._w_kernel = w_k

        # Shared row padded to full embed_dim (f32, exact).
        self._shared_kernel = (jnp.zeros((1, embed_dim), jnp.float32)
                               .at[:, : self.col_embed_dim]
                               .set(self.shared_embed))

        self._kernel_resident = _resident_kernel
        self._kernel_ktiled = _make_ktiled_kernel(tk)

    # ------------------------------------------------------------------ call
    def __call__(self, x: jnp.ndarray) -> jnp.ndarray:
        B = int(x.shape[0])
        D = self.embed_dim
        TB = _pick_batch_tile(B)
        B_pad = _round_up(B, TB)
        nb = B_pad // TB
        nk = self._num_k

        if B_pad == B:
            idx2d = x.astype(jnp.int32).reshape(B, 1)
        else:
            idx2d = (jnp.zeros((B_pad, 1), jnp.int32)
                     .at[:B, 0].set(x.astype(jnp.int32)))

        # ---- VMEM budget (counts actual buffering), capped per generation --
        itemsize = self.table_dtype.itemsize
        d_lanes = self._d_lanes
        table_buf = ((1 if nk == 1 else 2) * self._TK * d_lanes * itemsize
                     if nk > 1 else 1 * self._NEp * d_lanes * itemsize)
        needed = (table_buf
                  + 8 * 128 * 4                      # shared row, 1 buffer
                  + 2 * TB * 128 * 4                 # idx blocks (lane-padded)
                  + 2 * TB * d_lanes * 4             # out blocks
                  + TB * self._TK * 4                # one-hot intermediate
                  + 2 * TB * d_lanes * 4)            # emb + accumulator
        vmem_limit = int(min(self._vmem_cap - (8 << 20),
                             max(2 * needed, 32 << 20)))

        out_shape = jax.ShapeDtypeStruct((B_pad, D), jnp.float32)

        if nk == 1:
            grid_spec = pltpu.PrefetchScalarGridSpec(
                num_scalar_prefetch=0,
                grid=(nb,),
                in_specs=[
                    pl.BlockSpec((TB, 1), lambda i: (i, 0)),
                    _spec((self._NEp, D), lambda i: (0, 0), buffers=1),
                    _spec((1, D), lambda i: (0, 0), buffers=1),
                ],
                out_specs=pl.BlockSpec((TB, D), lambda i: (i, 0)),
            )
            kernel = self._kernel_resident
            dims = ("parallel",)
        else:
            grid_spec = pltpu.PrefetchScalarGridSpec(
                num_scalar_prefetch=0,
                grid=(nb, nk),
                in_specs=[
                    pl.BlockSpec((TB, 1), lambda i, k: (i, 0)),
                    pl.BlockSpec((self._TK, D), lambda i, k: (k, 0)),
                    _spec((1, D), lambda i, k: (0, 0), buffers=1),
                ],
                out_specs=pl.BlockSpec((TB, D), lambda i, k: (i, 0)),
                scratch_shapes=[pltpu.VMEM((TB, D), jnp.float32)],
            )
            kernel = self._kernel_ktiled
            dims = ("parallel", "arbitrary")

        out = pl.pallas_call(
            kernel,
            out_shape=out_shape,
            grid_spec=grid_spec,
            compiler_params=pltpu.CompilerParams(
                dimension_semantics=dims,
                vmem_limit_bytes=vmem_limit),
        )(idx2d, self._w_kernel, self._shared_kernel)

        return out if B_pad == B else out[:B]

    # ------------------------------------------------------------- reference
    def reference(self, x: jnp.ndarray) -> jnp.ndarray:
        """Pure-JAX (f32) reference matching the PyTorch forward."""
        out = self.weight[x.astype(jnp.int32)]
        shared = jnp.broadcast_to(self.shared_embed,
                                  (x.shape[0], self.col_embed_dim))
        if self.add_shared_embed:
            return out + shared
        return out.at[:, : self.col_embed_dim].set(shared)


# --------------------------------------------------------------------------- #
if __name__ == "__main__":
    key = jax.random.PRNGKey(0)
    k_param, k_idx1, k_idx2, k_param2, k_idx3 = jax.random.split(key, 5)

    num_embed, embed_dim, batch = 16, 32, 8
    x = jax.random.randint(k_idx1, (batch,), 0, num_embed, dtype=jnp.int32)

    # mode 1: overwrite first frac_shared_embed * embed_dim columns
    mod_replace = SharedEmbeddingsPallas(num_embed, embed_dim,
                                         add_shared_embed=False,
                                         frac_shared_embed=0.25,
                                         key=k_param)
    out_replace = jax.block_until_ready(mod_replace(x))
    assert out_replace.shape == (batch, embed_dim)
    assert jnp.allclose(out_replace, mod_replace.reference(x), atol=1e-5), \
        "replace-mode mismatch"

    # mode 2: add shared embedding to every column
    mod_add = SharedEmbeddingsPallas(num_embed, embed_dim,
                                     add_shared_embed=True,
                                     frac_shared_embed=0.25,
                                     key=k_param)
    out_add = jax.block_until_ready(mod_add(x))
    assert out_add.shape == (batch, embed_dim)
    assert jnp.allclose(out_add, mod_add.reference(x), atol=1e-5), \
        "add-mode mismatch"

    # batch not a multiple of 8 (exercises batch padding / final slice)
    x_odd = jax.random.randint(k_idx2, (5,), 0, num_embed, dtype=jnp.int32)
    out_odd = jax.block_until_ready(mod_replace(x_odd))
    assert out_odd.shape == (5, embed_dim)
    assert jnp.allclose(out_odd, mod_replace.reference(x_odd), atol=1e-5), \
        "odd-batch mismatch"

    # K-tiled (streamed table) path: forced small vocab tile -> 3 K steps
    mod_kt = SharedEmbeddingsPallas(300, embed_dim,
                                    add_shared_embed=False,
                                    frac_shared_embed=0.25,
                                    key=k_param2, vocab_tile=128)
    x_kt = jax.random.randint(k_idx3, (16,), 0, 300, dtype=jnp.int32)
    out_kt = jax.block_until_ready(mod_kt(x_kt))
    assert out_kt.shape == (16, embed_dim)
    assert jnp.allclose(out_kt, mod_kt.reference(x_kt), atol=1e-5), \
        "k-tiled mismatch"

    # bf16 table option (halves table VMEM/HBM; exact 0/1 one-hot, f32 accum)
    mod_bf16 = SharedEmbeddingsPallas(num_embed, embed_dim,
                                      add_shared_embed=True,
                                      frac_shared_embed=0.25,
                                      key=k_param, table_dtype=jnp.bfloat16)
    out_bf16 = jax.block_until_ready(mod_bf16(x))
    assert out_bf16.shape == (batch, embed_dim)
    assert jnp.allclose(out_bf16, mod_bf16.reference(x), atol=2e-2), \
        "bf16 table mismatch"

    print("KERNEL_OK")
</pallas_src>

<mosaic_0001>
module attributes {stable_mosaic.version = 11 : i64} {
  func.func @_resident_kernel(%arg0: i32, %arg1: memref<8x1xi32, #tpu.memory_space<vmem>>, %arg2: memref<128x32xf32, #tpu.memory_space<vmem>>, %arg3: memref<1x32xf32, #tpu.memory_space<vmem>>, %arg4: memref<8x32xf32, #tpu.memory_space<vmem>>) attributes {dimension_semantics = [#tpu.dimension_semantics<parallel>], iteration_bounds = array<i64: 1>, scalar_prefetch = 0 : i64, scratch_operands = 0 : i64, tpu.core_type = #tpu.core_type<tc>, window_params = [{transform_indices = @transform_0, window_bounds = array<i64: 8, 1>}, {pipeline_mode = #tpu.pipeline_mode<synchronous>, transform_indices = @transform_1, window_bounds = array<i64: 128, 32>}, {pipeline_mode = #tpu.pipeline_mode<synchronous>, transform_indices = @transform_2, window_bounds = array<i64: 1, 32>}, {transform_indices = @transform_3, window_bounds = array<i64: 8, 32>}]} {
    %c0 = arith.constant 0 : index
    %c0_0 = arith.constant 0 : index
    %0 = vector.load %arg1[%c0, %c0_0] : memref<8x1xi32, #tpu.memory_space<vmem>>, vector<8x1xi32>
    %1 = tpu.iota {dimensions = array<i32: 1>} : vector<8x128xi32>
    %2 = vector.broadcast %0 : vector<8x1xi32> to vector<8x128xi32>
    %3 = arith.cmpi eq, %1, %2 : vector<8x128xi32>
    %4 = arith.extui %3 : vector<8x128xi1> to vector<8x128xi32>
    %5 = arith.sitofp %4 : vector<8x128xi32> to vector<8x128xf32>
    %c0_1 = arith.constant 0 : index
    %c0_2 = arith.constant 0 : index
    %6 = vector.load %arg2[%c0_1, %c0_2] : memref<128x32xf32, #tpu.memory_space<vmem>>, vector<128x32xf32>
    %cst = arith.constant dense<0.000000e+00> : vector<8x32xf32>
    %7 = tpu.matmul %5, %6, %cst {dimension_numbers = #tpu.dot_dimension_numbers<[1], [0], [0], [1], [0, 0, 1, 1], [], []>} : vector<8x128xf32>, vector<128x32xf32>, vector<8x32xf32> -> vector<8x32xf32>
    %c0_3 = arith.constant 0 : index
    %c0_4 = arith.constant 0 : index
    %8 = vector.load %arg3[%c0_3, %c0_4] : memref<1x32xf32, #tpu.memory_space<vmem>>, vector<1x32xf32>
    %9 = vector.broadcast %8 : vector<1x32xf32> to vector<8x32xf32>
    %10 = arith.addf %7, %9 : vector<8x32xf32>
    %c0_5 = arith.constant 0 : index
    %c0_6 = arith.constant 0 : index
    %11 = vector.load %arg4[%c0_5, %c0_6] : memref<8x32xf32, #tpu.memory_space<vmem>>, vector<8x32xf32>
    tpu.vector_store %arg4[%c0_5, %c0_6], %10 {strides = array<i32>} : memref<8x32xf32, #tpu.memory_space<vmem>>, vector<8x32xf32>,
    return
  }
  func.func @transform_0(%arg0: i32) -> (i32, i32) {
    %c0_i32 = arith.constant 0 : i32
    %c0_i32_0 = arith.constant 0 : i32
    return %arg0, %c0_i32 : i32, i32
  }
  func.func @transform_1(%arg0: i32) -> (i32, i32) {
    %c0_i32 = arith.constant 0 : i32
    %c0_i32_0 = arith.constant 0 : i32
    %c0_i32_1 = arith.constant 0 : i32
    return %c0_i32, %c0_i32_0 : i32, i32
  }
  func.func @transform_2(%arg0: i32) -> (i32, i32) {
    %c0_i32 = arith.constant 0 : i32
    %c0_i32_0 = arith.constant 0 : i32
    %c0_i32_1 = arith.constant 0 : i32
    return %c0_i32, %c0_i32_0 : i32, i32
  }
  func.func @transform_3(%arg0: i32) -> (i32, i32) {
    %c0_i32 = arith.constant 0 : i32
    %c0_i32_0 = arith.constant 0 : i32
    return %arg0, %c0_i32 : i32, i32
  }
}

</mosaic_0001>

<bundles_post_ra>
// kernel: tpu_custom_call.1
= control target key start
LH: loop header
LB: loop body
LE: loop exit
PB: predicated region body
PF: predicated region fallthrough
CT: control target
= control target key end

     0   :  { %v243_v3 = vmov 0   ;;  %v244_v4 = vmov 0.0|0.0   ;;  %vm245_vm0 = vmmov 0   ;;  %v246_v8 = vmov 0.0   ;;  %s335_s0 = inlined_call_operand.vmem [shape: s32[8,1], index: 0, kind: input, shape index: {}]   ;;  %s336_s1 = inlined_call_operand.vmem [shape: f32[128,32], index: 1, kind: input, shape index: {}]   ;;  %s337_s2 = inlined_call_operand.vmem [shape: f32[1,32], index: 2, kind: input, shape index: {}]   ;;  %s338_s3 = inlined_call_operand.hbm [shape: f32[8,32], index: 3, kind: output, shape index: {}]  }
   0x1   :  { %v15_v0 = vld [vmem:[%s335_s0] sm:$0xff]  ;;  %v25_v2 = vld [vmem:[%s336_s1 + $0x8] sm:$0xff]  ;;  %218 = vset.pattern.permute.xlu0 %v243_v3  ;;  %188 = vmatprep.subr.bf16.mxu0 %v244_v4  ;;  %v26_v6 = vld [vmem:[%s336_s1 + $0x10] sm:$0xff] }
   0x2   :  { %v24_v1 = vld [vmem:[%s336_s1] sm:$0xff]  ;;  %v27_v7 = vld [vmem:[%s336_s1 + $0x18] sm:$0xff]  ;;  %19 = vperm.xlu0 %218, %v15_v0   ;;  %185 = vmatprep.mubr.msk.f32.mxu0 %vm245_vm0, %v246_v8  ;;  %v29_v11 = vld [vmem:[%s336_s1 + $0x28] sm:$0xff] }
   0x3   :  { %v189_v5 = vpack.c.bf16 %v25_v2, %v24_v1  ;;  %v192_v9 = vpack.c.bf16 %v27_v7, %v26_v6  ;;  %v28_v10 = vld [vmem:[%s336_s1 + $0x20] sm:$0xff] }
   0x5   :  { %190 = vmatpush3.bf16.msra.mxu0 %v189_v5 }
   0x6   :  { %191 = vmatprep.subr.bf16.mxu0 %v244_v4 }
   0x7   :  { %8 = vsyncpa [#allocation3], 0  ;;  %v195_v12 = vpack.c.bf16 %v29_v11, %v28_v10  ;;  %v30_v13 = vld [vmem:[%s336_s1 + $0x30] sm:$0xff]  ;;  %v31_v14 = vld [vmem:[%s336_s1 + $0x38] sm:$0xff]  ;;  %v16_v28 = vlaneseq  ;;  %v247_v31 = vmov 1.0   ;;  %s248_s20 = smov [#allocation2]  }
   0x8   :  { %v198_v15 = vpack.c.bf16 %v31_v14, %v30_v13  ;;  %v32_v16 = vld [vmem:[%s336_s1 + $0x40] sm:$0xff]  ;;  %v33_v17 = vld [vmem:[%s336_s1 + $0x48] sm:$0xff]  ;;  %v34_v19 = vld [vmem:[%s336_s1 + $0x50] sm:$0xff]  ;;  %s125_s21 = sshll.u32 %s248_s20, 4  ;;  %vm117_vm2 = vcmask 261120   ;;  %s126_s21 = int_to_ptr.vmem [resolvable:$true] %s125_s21 }
   0x9   :  { %193 = vmatpush3.bf16.msra.mxu0 %v192_v9  ;;  %v201_v18 = vpack.c.bf16 %v33_v17, %v32_v16  ;;  %v35_v20 = vld [vmem:[%s336_s1 + $0x58] sm:$0xff]  ;;  %v36_v22 = vld [vmem:[%s336_s1 + $0x60] sm:$0xff]  ;;  %v37_v23 = vld [vmem:[%s336_s1 + $0x68] sm:$0xff]  ;;  %v17_v29 = vand.u32 127, %v16_v28  ;;  %p224_p1 = scmp.lt.s32.totalorder %s126_s21, %s126_s21 }
   0xa   :  { %194 = vmatprep.subr.bf16.mxu0 %v244_v4  ;;  %v204_v21 = vpack.c.bf16 %v35_v20, %v34_v19  ;;  %v207_v24 = vpack.c.bf16 %v37_v23, %v36_v22  ;;  %v38_v25 = vld [vmem:[%s336_s1 + $0x70] sm:$0xff]  ;;  %v39_v26 = vld [vmem:[%s336_s1 + $0x78] sm:$0xff]  ;;  %v134_v32 = vld [vmem:[%s337_s2] ss:$0 sm:$0xff]  ;;  %s219_s1 = scalar_lea.vmem %s126_s21, 128 }
   0xb   :  { %v210_v27 = vpack.c.bf16 %v39_v26, %v38_v25  ;;  %p220_p0 = scmp.ne.s32.totalorder %s126_s21, %s219_s1  ;;  %p225_p2 = scmp.lt.s32.totalorder %s219_s1, %s219_s1 }
   0xd   :  { %196 = vmatpush3.bf16.msra.mxu0 %v195_v12  ;;  %p226_p3 = por %p225_p2, %p224_p1 }
   0xe   :  { %197 = vmatprep.subr.bf16.mxu0 %v244_v4 }
   0xf   :  { %p227_p4 = pnand %p226_p3, %p220_p0 }
  0x11   :  { %199 = vmatpush3.bf16.msra.mxu0 %v198_v15 }
  0x12   :  { %200 = vmatprep.subr.bf16.mxu0 %v244_v4 }
  0x15   :  { %202 = vmatpush3.bf16.msra.mxu0 %v201_v18 }
  0x16   :  { %203 = vmatprep.subr.bf16.mxu0 %v244_v4 }
  0x19   :  { %205 = vmatpush3.bf16.msra.mxu0 %v204_v21 }
  0x1a   :  { %206 = vmatprep.subr.bf16.mxu0 %v244_v4 }
  0x1d   :  { %208 = vmatpush3.bf16.msra.mxu0 %v207_v24 }
  0x1e   :  { %209 = vmatprep.subr.bf16.mxu0 %v244_v4 }
  0x21   :  { %211 = vmatpush3.bf16.msra.mxu0 %v210_v27 }
  0x81   :  { %v20_v30 = vpop.permute.xlu0 %19 }
  0x82   :  { %vm21_vm1 = vcmp.eq.s32.totalorder %v17_v29, %v20_v30 }
  0x83   :  { %186 = vmatmul.mubr.msk.f32.vlgmr.msra.gmra.mrb[0].mxu0 %vm21_vm1, %v247_v31 }
 0x156   :  { %v113_v33 = vpop.f32.mrb[0].mxu0 }
 0x157   :  { %v114_v34 = vadd.f32 %v134_v32, %v113_v33  ;;  %v187_v35 = vpop.f32.mrb[1].mxu0 }
 0x159   :  { %118 = vst.msk [vmem:[#allocation2] sm:$0xff] %vm117_vm2, %v114_v34 }
 0x15a   :  { %230 = shalt.err (!%p227_p4)
}
 0x15b   :  { %s231_s23 = scalar_lea.hbm %s338_s3, 128 }
 0x15c   :  { %p232_p5 = scmp.ne.s32.totalorder %s338_s3, %s231_s23  ;;  %p235_p6 = scmp.lt.u32.totalorder %s231_s23, %s338_s3 }
 0x15e   :  { %p237_p7 = pnand %p235_p6, %p232_p5 }
 0x160   :  { %240 = shalt.err (!%p237_p7)
}
 0x161   :  { %128 = dma.vmem_to_hbm [thread:$0]  %s126_s21, 128, %s338_s3, [#allocation3]  }
 0x162   :  { %241 = dma.done.wait [#allocation3], 128  }
 0x163   :  { %242 = vsyncadd [#allocation3], 4294967168 }
 0x164   :  { %132 = vsyncpa [#allocation3], 1 }

</bundles_post_ra>
